<compile_context>
chip_gen: v7x
topology: tpu7x:2x2x1
jax: 0.10.0
libtpu: 0.0.40
codegen_flags: <defaults>
</compile_context>

<pallas_src>
import functools
import math

import jax
import jax.numpy as jnp
from jax.experimental import pallas as pl
from jax.experimental.pallas import tpu as pltpu


def encoder_seq_kernel(tok_ref, emb_ref, h0_ref, wih_ref, whh_ref,
                       bg_ref, bhn_ref, out_ref, h_ref, *, n_layers, hp):
    """One grid step = one token through n_layers GRU applications.

    tok_ref: (T,)        i32  SMEM   scalar-prefetched token ids
    emb_ref: (V, Hp)     f32  VMEM   embedding table (resident, constant block)
    h0_ref:  (1, Hp)     f32  VMEM   initial hidden state
    wih_ref: (Hp, 3*Hp)  bf16 VMEM   fused input->hidden weights, cols [r|z|n]
    whh_ref: (Hp, 3*Hp)  bf16 VMEM   fused hidden->hidden weights, cols [r|z|n]
    bg_ref:  (1, 3*Hp)   f32  VMEM   fused gate bias: r/z = b_ih+b_hh, n = b_ih_n
    bhn_ref: (1, Hp)     f32  VMEM   b_hh_n (added inside the r*(...) term)
    out_ref: (T, Hp)     f32  VMEM   per-step hidden states (resident slab)
    h_ref:   (1, Hp)     f32  VMEM   scratch: hidden carried across grid steps
    """
    t = pl.program_id(0)

    @pl.when(t == 0)
    def _():
        h_ref[...] = h0_ref[...]

    tok = tok_ref[t]
    # In-kernel embedding row gather (dynamic sublane slice of resident table).
    x_bf = emb_ref[pl.ds(tok, 1), :].astype(jnp.bfloat16)        # (1, Hp)
    h = h_ref[...]                                               # (1, Hp) f32

    # n_layers is a small static int; the weights are re-read from the VMEM
    # refs at every dot rather than hoisted (keeps vreg pressure low).
    for _ in range(n_layers):
        gi = jnp.dot(x_bf, wih_ref[...],
                     preferred_element_type=jnp.float32) + bg_ref[...]
        gh = jnp.dot(h.astype(jnp.bfloat16), whh_ref[...],
                     preferred_element_type=jnp.float32)
        r = jax.nn.sigmoid(gi[:, 0:hp] + gh[:, 0:hp])
        z = jax.nn.sigmoid(gi[:, hp:2 * hp] + gh[:, hp:2 * hp])
        n = jnp.tanh(gi[:, 2 * hp:3 * hp]
                     + r * (gh[:, 2 * hp:3 * hp] + bhn_ref[...]))
        h = (h - n) * z + n          # == (1 - z) * n + z * h
        x_bf = h.astype(jnp.bfloat16)  # next layer's input

    h_ref[...] = h
    out_ref[pl.ds(t, 1), :] = h


@functools.partial(jax.jit, static_argnames=("n_layers",))
def encoder_seq_pallas(tokens, h0, emb, w_ih, w_hh, b_g, b_hn, *, n_layers):
    """tokens: (T,) i32; h0: (1, Hp) f32; emb: (V, Hp) f32; fused weights bf16."""
    T = tokens.shape[0]
    V, hp = emb.shape

    weight_bytes = (w_ih.size * w_ih.dtype.itemsize
                    + w_hh.size * w_hh.dtype.itemsize)
    act_bytes = (emb.size * emb.dtype.itemsize      # resident embedding table
                 + T * hp * 4                       # resident output slab
                 + 32 * hp * 4)                     # hidden scratch + gate temps
    # Weights counted once + activations + headroom; clamp to <= 48 MiB (v7x
    # has only 64 MiB physical VMEM).
    vmem_limit = int(min(max(weight_bytes + act_bytes + (4 << 20), 8 << 20),
                         48 << 20))

    cost = pl.CostEstimate(
        flops=2 * 2 * hp * 3 * hp * n_layers * T,          # two (1,Hp)@(Hp,3Hp)
        transcendentals=3 * hp * n_layers * T,             # 2 sigmoid + 1 tanh
        bytes_accessed=(weight_bytes + emb.size * emb.dtype.itemsize
                        + T * hp * 4 + T * 4 + 2 * hp * 4 + 4 * hp * 4),
    )

    kernel = functools.partial(encoder_seq_kernel, n_layers=n_layers, hp=hp)

    grid_spec = pltpu.PrefetchScalarGridSpec(
        num_scalar_prefetch=1,
        grid=(T,),
        in_specs=[
            # All blocks are full-array with constant index maps -> DMA'd once,
            # VMEM-resident for every time step.
            pl.BlockSpec((V, hp), lambda t, tok: (0, 0)),        # embedding
            pl.BlockSpec((1, hp), lambda t, tok: (0, 0)),        # h0
            pl.BlockSpec((hp, 3 * hp), lambda t, tok: (0, 0)),   # W_ih fused
            pl.BlockSpec((hp, 3 * hp), lambda t, tok: (0, 0)),   # W_hh fused
            pl.BlockSpec((1, 3 * hp), lambda t, tok: (0, 0)),    # fused gate bias
            pl.BlockSpec((1, hp), lambda t, tok: (0, 0)),        # b_hh_n
        ],
        # Resident output slab (constant block index): each step writes row t,
        # whole slab written back to HBM once at the end of the grid.
        out_specs=pl.BlockSpec((T, hp), lambda t, tok: (0, 0)),
        scratch_shapes=[pltpu.VMEM((1, hp), jnp.float32)],
    )

    return pl.pallas_call(
        kernel,
        out_shape=jax.ShapeDtypeStruct((T, hp), jnp.float32),
        grid_spec=grid_spec,
        compiler_params=pltpu.CompilerParams(
            dimension_semantics=("arbitrary",),   # time steps are sequential
            vmem_limit_bytes=vmem_limit),
        cost_estimate=cost,
    )(tokens, emb, h0, w_ih, w_hh, b_g, b_hn)


def _round_up(n, m):
    return ((n + m - 1) // m) * m


def _fuse_pad_weight(w, H, Hp):
    """Torch-layout (3H, H) weight -> (Hp, 3*Hp); cols [g*Hp, g*Hp+H) = w_g.T."""
    out = jnp.zeros((Hp, 3 * Hp), jnp.float32)
    for g in range(3):
        out = out.at[:H, g * Hp:g * Hp + H].set(w[g * H:(g + 1) * H, :].T)
    return out


class EncoderRNNPallas:
    """JAX/Pallas port of EncoderRNN.forward (plus a fused-sequence entry point)."""

    def __init__(self, input_size, hidden_size, n_layers=1, key=None):
        self.n_layers = n_layers
        self.hidden_size = hidden_size
        # Pad hidden to a multiple of 256: aligned to v6e/v7x 256x256 MXU and
        # lane-dense (multiple of 128) for v5e.
        self.hp = max(256, _round_up(hidden_size, 256))
        if key is None:
            key = jax.random.PRNGKey(0)
        k_emb, k_wih, k_whh, k_bih, k_bhh = jax.random.split(key, 5)
        H, Hp = hidden_size, self.hp
        scale = 1.0 / math.sqrt(H)

        # nn.Embedding(input_size, hidden_size), zero-padded on the lane axis.
        emb = jax.random.normal(k_emb, (input_size, H), jnp.float32)
        self.embedding = jnp.zeros((input_size, Hp), jnp.float32).at[:, :H].set(emb)

        # nn.GRU(hidden_size, hidden_size) parameters (torch layout, gate order
        # r,z,n), then fused/transposed/padded so gi = x @ W_ih_fused.
        w_ih = jax.random.uniform(k_wih, (3 * H, H), jnp.float32, -scale, scale)
        w_hh = jax.random.uniform(k_whh, (3 * H, H), jnp.float32, -scale, scale)
        b_ih = jax.random.uniform(k_bih, (3 * H,), jnp.float32, -scale, scale)
        b_hh = jax.random.uniform(k_bhh, (3 * H,), jnp.float32, -scale, scale)
        self.w_ih = _fuse_pad_weight(w_ih, H, Hp).astype(jnp.bfloat16)
        self.w_hh = _fuse_pad_weight(w_hh, H, Hp).astype(jnp.bfloat16)

        # Fused gate bias: r/z columns = b_ih+b_hh, n column = b_ih_n only.
        b_g = jnp.zeros((1, 3 * Hp), jnp.float32)
        for g in range(2):
            b_g = b_g.at[0, g * Hp:g * Hp + H].set(
                b_ih[g * H:(g + 1) * H] + b_hh[g * H:(g + 1) * H])
        b_g = b_g.at[0, 2 * Hp:2 * Hp + H].set(b_ih[2 * H:3 * H])
        self.b_g = b_g
        # b_hh_n, added inside r * (gh_n + b_hn).
        self.b_hn = jnp.zeros((1, Hp), jnp.float32).at[0, :H].set(b_hh[2 * H:3 * H])

    def init_hidden(self):
        return jnp.zeros((1, 1, self.hidden_size), jnp.float32)

    def encode_sequence(self, tokens, hidden):
        """Run ALL tokens through the GRU in ONE pallas_call.

        tokens: (T,) int32; hidden: (1, 1, H).
        Returns (outputs (T, 1, H), hidden (1, 1, H)).
        """
        H, Hp = self.hidden_size, self.hp
        tokens = jnp.asarray(tokens, jnp.int32).reshape(-1)
        # Pad the hidden once per sequence (not per token).
        h0 = jnp.zeros((1, Hp), jnp.float32).at[:, :H].set(hidden.reshape(1, H))
        outs = encoder_seq_pallas(tokens, h0, self.embedding, self.w_ih,
                                  self.w_hh, self.b_g, self.b_hn,
                                  n_layers=self.n_layers)        # (T, Hp)
        outputs = outs[:, :H].reshape(-1, 1, H)
        hidden_out = outs[-1:, :H].reshape(1, 1, H)
        return outputs, hidden_out

    def __call__(self, token, hidden):
        """Matches EncoderRNN.forward: one token step -> (output, hidden)."""
        tokens = jnp.asarray(token, jnp.int32).reshape(1)
        outputs, hidden_out = self.encode_sequence(tokens, hidden)
        # For seq_len=1 the GRU output equals the new hidden state.
        return outputs.reshape(1, 1, self.hidden_size), hidden_out


def _encoder_ref_steps(tokens, h, emb, w_ih, w_hh, b_g, b_hn, n_layers, hp):
    """Pure-JAX reference mirroring the kernel's bf16-weight / f32-accum math."""
    wi = w_ih.astype(jnp.float32)
    wh = w_hh.astype(jnp.float32)
    outs = []
    for t in range(tokens.shape[0]):
        xb = emb[tokens[t]].reshape(1, hp).astype(jnp.bfloat16).astype(jnp.float32)
        for _ in range(n_layers):
            hb = h.astype(jnp.bfloat16).astype(jnp.float32)
            gi = jnp.dot(xb, wi, precision=jax.lax.Precision.HIGHEST) + b_g
            gh = jnp.dot(hb, wh, precision=jax.lax.Precision.HIGHEST)
            r = jax.nn.sigmoid(gi[:, 0:hp] + gh[:, 0:hp])
            z = jax.nn.sigmoid(gi[:, hp:2 * hp] + gh[:, hp:2 * hp])
            n = jnp.tanh(gi[:, 2 * hp:3 * hp] + r * (gh[:, 2 * hp:3 * hp] + b_hn))
            h = (h - n) * z + n
            xb = h.astype(jnp.bfloat16).astype(jnp.float32)
        outs.append(h)
    return jnp.concatenate(outs, axis=0), h


if __name__ == "__main__":
    input_size = 16     # vocabulary size
    hidden_size = 256   # original script's hidden_size (MXU/lane aligned)
    seq_len = 8
    key = jax.random.PRNGKey(0)

    enc = EncoderRNNPallas(input_size, hidden_size, n_layers=1, key=key)

    tokens = jax.random.randint(jax.random.fold_in(key, 7), (seq_len,),
                                0, input_size, jnp.int32)
    hidden0 = enc.init_hidden()

    # (1) Whole token loop folded into ONE pallas_call.
    outputs, hidden = enc.encode_sequence(tokens, hidden0)
    outputs = jax.block_until_ready(outputs)
    hidden = jax.block_until_ready(hidden)
    assert outputs.shape == (seq_len, 1, hidden_size)
    assert hidden.shape == (1, 1, hidden_size)

    # (2) Semantics check: per-token calls (original EncoderRNN.forward
    #     contract) reproduce the fused-sequence trajectory.
    h_step = hidden0
    step_outs = []
    for t in range(seq_len):
        out_t, h_step = enc(tokens[t], h_step)
        step_outs.append(out_t)
    step_outs = jnp.concatenate(step_outs, axis=0).reshape(seq_len, 1, hidden_size)
    step_err = jnp.max(jnp.abs(step_outs - outputs))
    assert step_err < 1e-3, f"per-token vs fused-sequence mismatch {step_err}"

    # (3) Numerics check against a pure-JAX reference of the same fused math.
    Hp = enc.hp
    ref_outs, _ = _encoder_ref_steps(tokens, jnp.zeros((1, Hp), jnp.float32),
                                     enc.embedding, enc.w_ih, enc.w_hh,
                                     enc.b_g, enc.b_hn, enc.n_layers, Hp)
    err = jnp.max(jnp.abs(outputs.reshape(seq_len, hidden_size)
                          - ref_outs[:, :hidden_size]))
    assert err < 1e-3, f"max abs error {err}"

    print("KERNEL_OK")
</pallas_src>

<mosaic_0001>
module attributes {stable_mosaic.version = 11 : i64} {
  func.func @encoder_seq_kernel(%arg0: i32, %arg1: memref<8xi32, #tpu.memory_space<smem>>, %arg2: memref<16x256xf32, #tpu.memory_space<vmem>>, %arg3: memref<1x256xf32, #tpu.memory_space<vmem>>, %arg4: memref<256x768xbf16, #tpu.memory_space<vmem>>, %arg5: memref<256x768xbf16, #tpu.memory_space<vmem>>, %arg6: memref<1x768xf32, #tpu.memory_space<vmem>>, %arg7: memref<1x256xf32, #tpu.memory_space<vmem>>, %arg8: memref<8x256xf32, #tpu.memory_space<vmem>>, %arg9: memref<1x256xf32, #tpu.memory_space<vmem>>) attributes {dimension_semantics = [#tpu.dimension_semantics<arbitrary>], iteration_bounds = array<i64: 8>, scalar_prefetch = 1 : i64, scratch_operands = 1 : i64, tpu.core_type = #tpu.core_type<tc>, window_params = [{pipeline_mode = #tpu.pipeline_mode<synchronous>, transform_indices = @transform_0, window_bounds = array<i64: 16, 256>}, {pipeline_mode = #tpu.pipeline_mode<synchronous>, transform_indices = @transform_1, window_bounds = array<i64: 1, 256>}, {pipeline_mode = #tpu.pipeline_mode<synchronous>, transform_indices = @transform_2, window_bounds = array<i64: 256, 768>}, {pipeline_mode = #tpu.pipeline_mode<synchronous>, transform_indices = @transform_3, window_bounds = array<i64: 256, 768>}, {pipeline_mode = #tpu.pipeline_mode<synchronous>, transform_indices = @transform_4, window_bounds = array<i64: 1, 768>}, {pipeline_mode = #tpu.pipeline_mode<synchronous>, transform_indices = @transform_5, window_bounds = array<i64: 1, 256>}, {pipeline_mode = #tpu.pipeline_mode<synchronous>, transform_indices = @transform_6, window_bounds = array<i64: 8, 256>}]} {
    %c0_i32 = arith.constant 0 : i32
    %0 = arith.cmpi eq, %arg0, %c0_i32 : i32
    %1 = arith.extui %0 : i1 to i32
    %c0_i32_0 = arith.constant 0 : i32
    %2 = arith.cmpi ne, %1, %c0_i32_0 : i32
    scf.if %2 {
      %c0_17 = arith.constant 0 : index
      %c0_18 = arith.constant 0 : index
      %45 = vector.load %arg3[%c0_17, %c0_18] : memref<1x256xf32, #tpu.memory_space<vmem>>, vector<1x256xf32>
      %c0_19 = arith.constant 0 : index
      %c0_20 = arith.constant 0 : index
      %46 = vector.load %arg9[%c0_19, %c0_20] : memref<1x256xf32, #tpu.memory_space<vmem>>, vector<1x256xf32>
      tpu.vector_store %arg9[%c0_19, %c0_20], %45 {strides = array<i32>} : memref<1x256xf32, #tpu.memory_space<vmem>>, vector<1x256xf32>,
    } else {
    }
    %3 = arith.index_cast %arg0 : i32 to index
    %4 = memref.load %arg1[%3] : memref<8xi32, #tpu.memory_space<smem>>
    %5 = arith.index_cast %4 : i32 to index
    %c0 = arith.constant 0 : index
    %6 = vector.load %arg2[%5, %c0] : memref<16x256xf32, #tpu.memory_space<vmem>>, vector<1x256xf32>
    %7 = arith.truncf %6 : vector<1x256xf32> to vector<1x256xbf16>
    %c0_1 = arith.constant 0 : index
    %c0_2 = arith.constant 0 : index
    %8 = vector.load %arg9[%c0_1, %c0_2] : memref<1x256xf32, #tpu.memory_space<vmem>>, vector<1x256xf32>
    %c0_3 = arith.constant 0 : index
    %c0_4 = arith.constant 0 : index
    %9 = vector.load %arg4[%c0_3, %c0_4] : memref<256x768xbf16, #tpu.memory_space<vmem>>, vector<256x768xbf16>
    %cst = arith.constant dense<0.000000e+00> : vector<1x768xf32>
    %10 = tpu.matmul %7, %9, %cst {dimension_numbers = #tpu.dot_dimension_numbers<[1], [0], [0], [1], [0, 0, 1, 1], [], []>} : vector<1x256xbf16>, vector<256x768xbf16>, vector<1x768xf32> -> vector<1x768xf32>
    %c0_5 = arith.constant 0 : index
    %c0_6 = arith.constant 0 : index
    %11 = vector.load %arg6[%c0_5, %c0_6] : memref<1x768xf32, #tpu.memory_space<vmem>>, vector<1x768xf32>
    %12 = arith.addf %10, %11 : vector<1x768xf32>
    %13 = arith.truncf %8 : vector<1x256xf32> to vector<1x256xbf16>
    %c0_7 = arith.constant 0 : index
    %c0_8 = arith.constant 0 : index
    %14 = vector.load %arg5[%c0_7, %c0_8] : memref<256x768xbf16, #tpu.memory_space<vmem>>, vector<256x768xbf16>
    %cst_9 = arith.constant dense<0.000000e+00> : vector<1x768xf32>
    %15 = tpu.matmul %13, %14, %cst_9 {dimension_numbers = #tpu.dot_dimension_numbers<[1], [0], [0], [1], [0, 0, 1, 1], [], []>} : vector<1x256xbf16>, vector<256x768xbf16>, vector<1x768xf32> -> vector<1x768xf32>
    %16 = vector.extract_strided_slice %12 {offsets = [0, 0], sizes = [1, 256], strides = [1, 1]} : vector<1x768xf32> to vector<1x256xf32>
    %17 = vector.extract_strided_slice %15 {offsets = [0, 0], sizes = [1, 256], strides = [1, 1]} : vector<1x768xf32> to vector<1x256xf32>
    %18 = arith.addf %16, %17 : vector<1x256xf32>
    %19 = arith.negf %18 : vector<1x256xf32>
    %20 = math.exp %19 : vector<1x256xf32>
    %cst_10 = arith.constant 1.000000e+00 : f32
    %21 = vector.broadcast %cst_10 : f32 to vector<1x256xf32>
    %22 = arith.addf %21, %20 : vector<1x256xf32>
    %23 = arith.divf %21, %22 : vector<1x256xf32>
    %24 = vector.extract_strided_slice %12 {offsets = [0, 256], sizes = [1, 256], strides = [1, 1]} : vector<1x768xf32> to vector<1x256xf32>
    %25 = vector.extract_strided_slice %15 {offsets = [0, 256], sizes = [1, 256], strides = [1, 1]} : vector<1x768xf32> to vector<1x256xf32>
    %26 = arith.addf %24, %25 : vector<1x256xf32>
    %27 = arith.negf %26 : vector<1x256xf32>
    %28 = math.exp %27 : vector<1x256xf32>
    %cst_11 = arith.constant 1.000000e+00 : f32
    %29 = vector.broadcast %cst_11 : f32 to vector<1x256xf32>
    %30 = arith.addf %29, %28 : vector<1x256xf32>
    %31 = arith.divf %29, %30 : vector<1x256xf32>
    %32 = vector.extract_strided_slice %12 {offsets = [0, 512], sizes = [1, 256], strides = [1, 1]} : vector<1x768xf32> to vector<1x256xf32>
    %33 = vector.extract_strided_slice %15 {offsets = [0, 512], sizes = [1, 256], strides = [1, 1]} : vector<1x768xf32> to vector<1x256xf32>
    %c0_12 = arith.constant 0 : index
    %c0_13 = arith.constant 0 : index
    %34 = vector.load %arg7[%c0_12, %c0_13] : memref<1x256xf32, #tpu.memory_space<vmem>>, vector<1x256xf32>
    %35 = arith.addf %33, %34 : vector<1x256xf32>
    %36 = arith.mulf %23, %35 : vector<1x256xf32>
    %37 = arith.addf %32, %36 : vector<1x256xf32>
    %38 = math.tanh %37 : vector<1x256xf32>
    %39 = arith.subf %8, %38 : vector<1x256xf32>
    %40 = arith.mulf %39, %31 : vector<1x256xf32>
    %41 = arith.addf %40, %38 : vector<1x256xf32>
    %c0_14 = arith.constant 0 : index
    %c0_15 = arith.constant 0 : index
    %42 = vector.load %arg9[%c0_14, %c0_15] : memref<1x256xf32, #tpu.memory_space<vmem>>, vector<1x256xf32>
    tpu.vector_store %arg9[%c0_14, %c0_15], %41 {strides = array<i32>} : memref<1x256xf32, #tpu.memory_space<vmem>>, vector<1x256xf32>,
    %43 = arith.index_cast %arg0 : i32 to index
    %c0_16 = arith.constant 0 : index
    %44 = vector.load %arg8[%43, %c0_16] : memref<8x256xf32, #tpu.memory_space<vmem>>, vector<1x256xf32>
    tpu.vector_store %arg8[%43, %c0_16], %41 {strides = array<i32>} : memref<8x256xf32, #tpu.memory_space<vmem>>, vector<1x256xf32>,
    return
  }
  func.func @transform_0(%arg0: i32, %arg1: memref<8xi32, #tpu.memory_space<smem>>) -> (i32, i32) {
    %c0_i32 = arith.constant 0 : i32
    %c0_i32_0 = arith.constant 0 : i32
    %c0_i32_1 = arith.constant 0 : i32
    return %c0_i32, %c0_i32_0 : i32, i32
  }
  func.func @transform_1(%arg0: i32, %arg1: memref<8xi32, #tpu.memory_space<smem>>) -> (i32, i32) {
    %c0_i32 = arith.constant 0 : i32
    %c0_i32_0 = arith.constant 0 : i32
    %c0_i32_1 = arith.constant 0 : i32
    return %c0_i32, %c0_i32_0 : i32, i32
  }
  func.func @transform_2(%arg0: i32, %arg1: memref<8xi32, #tpu.memory_space<smem>>) -> (i32, i32) {
    %c0_i32 = arith.constant 0 : i32
    %c0_i32_0 = arith.constant 0 : i32
    %c0_i32_1 = arith.constant 0 : i32
    return %c0_i32, %c0_i32_0 : i32, i32
  }
  func.func @transform_3(%arg0: i32, %arg1: memref<8xi32, #tpu.memory_space<smem>>) -> (i32, i32) {
    %c0_i32 = arith.constant 0 : i32
    %c0_i32_0 = arith.constant 0 : i32
    %c0_i32_1 = arith.constant 0 : i32
    return %c0_i32, %c0_i32_0 : i32, i32
  }
  func.func @transform_4(%arg0: i32, %arg1: memref<8xi32, #tpu.memory_space<smem>>) -> (i32, i32) {
    %c0_i32 = arith.constant 0 : i32
    %c0_i32_0 = arith.constant 0 : i32
    %c0_i32_1 = arith.constant 0 : i32
    return %c0_i32, %c0_i32_0 : i32, i32
  }
  func.func @transform_5(%arg0: i32, %arg1: memref<8xi32, #tpu.memory_space<smem>>) -> (i32, i32) {
    %c0_i32 = arith.constant 0 : i32
    %c0_i32_0 = arith.constant 0 : i32
    %c0_i32_1 = arith.constant 0 : i32
    return %c0_i32, %c0_i32_0 : i32, i32
  }
  func.func @transform_6(%arg0: i32, %arg1: memref<8xi32, #tpu.memory_space<smem>>) -> (i32, i32) {
    %c0_i32 = arith.constant 0 : i32
    %c0_i32_0 = arith.constant 0 : i32
    %c0_i32_1 = arith.constant 0 : i32
    return %c0_i32, %c0_i32_0 : i32, i32
  }
}

</mosaic_0001>

<bundles_post_ra>
// kernel: encoder_seq_pallas.1
= control target key start
LH: loop header
LB: loop body
LE: loop exit
PB: predicated region body
PF: predicated region fallthrough
CT: control target
= control target key end

     0   :  { %s2913_s0 = inlined_call_operand.hbm [shape: s32[8], index: 0, kind: input, shape index: {}]   ;;  %s2914_s1 = inlined_call_operand.hbm [shape: f32[16,256], index: 1, kind: input, shape index: {}]   ;;  %s2915_s2 = inlined_call_operand.vmem [shape: f32[1,256], index: 2, kind: input, shape index: {}]   ;;  %s2916_s3 = inlined_call_operand.hbm [shape: bf16[256,768], index: 3, kind: input, shape index: {}]   ;;  %s2917_s4 = inlined_call_operand.hbm [shape: bf16[256,768], index: 4, kind: input, shape index: {}]   ;;  %s2918_s5 = inlined_call_operand.vmem [shape: f32[1,768], index: 5, kind: input, shape index: {}]   ;;  %s2919_s6 = inlined_call_operand.vmem [shape: f32[1,256], index: 6, kind: input, shape index: {}]   ;;  %s2920_s7 = inlined_call_operand.hbm [shape: f32[8,256], index: 7, kind: output, shape index: {}]  }
   0x1   :  { %s2505_s26 = scalar_lea.hbm %s2913_s0, 16 }
   0x2   :  { %p2506_p0 = scmp.ne.s32.totalorder %s2913_s0, %s2505_s26  ;;  %p2509_p1 = scmp.lt.u32.totalorder %s2505_s26, %s2913_s0 }
   0x4   :  { %p2511_p2 = pnand %p2509_p1, %p2506_p0 }
   0x6   :  { %2514 = shalt.err (!%p2511_p2)  }
   0x7   :  { %s2647_s8 = smov [#allocation4]  }
   0x8   :  { %13 = dma.hbm_to_smem %s2913_s0, 16, %s2647_s8, [#allocation3] }
   0x9   :  { %2629 = dma.done.wait [#allocation3], 16 }
   0xa   :  { %2630 = vsyncadd [#allocation3], 4294967280 }
   0xb   :  { %15 = sfence }
   0xc   :  { %16 = vsyncpa [#allocation6], 0 }
   0xd   :  { %17 = vsyncpa [#allocation9], 0 }
   0xe   :  { %18 = vsyncpa [#allocation7], 0  ;;  %s2709_s11 = smov 0  }
   0xf LB: > { %s2648_s12 = smov [#allocation8]   ;;  %s2715_s14 = sadd.s32 4294967295, %s2645_s11   ;;  %s2645_s11 = sphi %s2709_s11, %s24_s11  }
  0x10   : > { %s204_s13 = sshll.u32 %s2648_s12, 4  ;;  %p1918_p3 = scmp.ge.s32.totalorder %s2645_s11, 1  ;;  %s2725_s13 = int_to_ptr.vmem [resolvable:$true] %s204_s13 }
  0x11   : > { %p176_p4 = scmp.lt.s32.totalorder %s2645_s11, 9  ;;  %p2921_p6 = scmp.eq.s32.totalorder %s2715_s14, 0 }
  0x12   : > { %s2649_s15 = smov [#allocation5]   ;;  %s2650_s18 = smov [#allocation10]  }
  0x13   : > { %p2721_p7 = pnand %p1918_p3, %p176_p4  ;;  %s188_s16 = sshll.u32 %s2649_s15, 4  ;;  %s2729_s16 = int_to_ptr.vmem [resolvable:$true] %s188_s16 }
  0x14   : > { %s2737_s19 = sshll.u32 %s2650_s18, 4  ;;  %s2515_s22 = scalar_lea.hbm %s2916_s3, 12288  ;;  %s218_s19 = int_to_ptr.vmem [resolvable:$true] %s2737_s19 }
  0x15   : > { %s2923_s0 = scalar_select %p2721_p7, 1, 0 }
  0x16   : > { %p2161_p8 = pneg %p2721_p7  ;;  %p2516_p10 = scmp.ne.s32.totalorder %s2916_s3, %s2515_s22 }
  0x17   : > { %p2522_p0 = scmp.lt.u32.totalorder %s2515_s22, %s2916_s3 }
  0x18   : > { %p2733_p9 = pnand %p2921_p6, %p2161_p8 }
  0x1a   : > { %p2747_p11 = pneg %p2733_p9 }
  0x1c   : > { %p2518_p12 = pnand %p2747_p11, %p2516_p10 }
  0x1e   : > { %p2519_p13 = pneg %p2518_p12 }
  0x20   : > { %p2524_p1 = pnand %p2522_p0, %p2519_p13 }
  0x22   : > { %2527 = shalt.err (!%p2524_p1)
}
  0x23   : > { %s2528_s28 = scalar_lea.vmem %s2725_s13, 12288  ;;  %p2536_p8 = scmp.lt.s32.totalorder %s2725_s13, %s2725_s13 }
  0x24   : > { %p2529_p2 = scmp.ne.s32.totalorder %s2725_s13, %s2528_s28  ;;  %p2537_p5 = scmp.lt.s32.totalorder %s2528_s28, %s2528_s28 }
  0x26   : > { %p2531_p3 = pnand %p2529_p2, %p2747_p11  ;;  %p2538_p10 = por %p2537_p5, %p2536_p8 }
  0x28   : > { %p2532_p4 = pneg %p2531_p3 }
  0x2a   : > { %p2539_p12 = pnand %p2538_p10, %p2532_p4 }
  0x2c   : > { %2542 = shalt.err (!%p2539_p12)
}
  0x2d   : > { %s2651_s29 = smov 384   ;;  %s2652_s30 = smov 24  }
  0x2e   : > { %2167 = dma.hbm_to_vmem [thread:$0]  (!%p2733_p9), %s2916_s3, 12288, %s2725_s13, [#allocation9], %s2651_s29, %s2651_s29, %s2652_s30  }
  0x2f   : > { %s2543_s15 = scalar_lea.hbm %s2914_s1, 512 }
  0x30   : > { %p2544_p5 = scmp.ne.s32.totalorder %s2914_s1, %s2543_s15  ;;  %p2550_p1 = scmp.lt.u32.totalorder %s2543_s15, %s2914_s1 }
  0x32   : > { %p2546_p13 = pnand %p2544_p5, %p2747_p11 }
  0x34   : > { %p2547_p0 = pneg %p2546_p13 }
  0x36   : > { %p2552_p2 = pnand %p2550_p1, %p2547_p0 }
  0x38   : > { %2555 = shalt.err (!%p2552_p2)
}
  0x39   : > { %s2556_s13 = scalar_lea.vmem %s2729_s16, 512  ;;  %p2564_p10 = scmp.lt.s32.totalorder %s2729_s16, %s2729_s16 }
  0x3a   : > { %p2557_p3 = scmp.ne.s32.totalorder %s2729_s16, %s2556_s13  ;;  %p2565_p12 = scmp.lt.s32.totalorder %s2556_s13, %s2556_s13 }
  0x3c   : > { %p2559_p4 = pnand %p2557_p3, %p2747_p11  ;;  %p2566_p5 = por %p2565_p12, %p2564_p10 }
  0x3e   : > { %p2560_p8 = pneg %p2559_p4 }
  0x40   : > { %p2567_p13 = pnand %p2566_p5, %p2560_p8 }
  0x42   : > { %2570 = shalt.err (!%p2567_p13)
}
  0x43   : > { %s2653_s23 = smov 256   ;;  %s2654_s24 = smov 16  }
  0x44   : > { %2164 = dma.hbm_to_vmem [thread:$0]  (!%p2733_p9), %s2914_s1, 512, %s2729_s16, [#allocation6], %s2653_s23, %s2653_s23, %s2654_s24  }
  0x45   : > { %s2571_s9 = scalar_lea.hbm %s2917_s4, 12288 }
  0x46   : > { %p2572_p0 = scmp.ne.s32.totalorder %s2917_s4, %s2571_s9  ;;  %p2578_p3 = scmp.lt.u32.totalorder %s2571_s9, %s2917_s4 }
  0x48   : > { %p2574_p1 = pnand %p2572_p0, %p2747_p11 }
  0x4a   : > { %p2575_p2 = pneg %p2574_p1 }
  0x4c   : > { %p2580_p4 = pnand %p2578_p3, %p2575_p2 }
  0x4e   : > { %2583 = shalt.err (!%p2580_p4)
}
  0x4f   : > { %s2584_s20 = scalar_lea.vmem %s218_s19, 12288  ;;  %p2592_p5 = scmp.lt.s32.totalorder %s218_s19, %s218_s19 }
  0x50   : > { %p2585_p8 = scmp.ne.s32.totalorder %s218_s19, %s2584_s20  ;;  %p2593_p13 = scmp.lt.s32.totalorder %s2584_s20, %s2584_s20 }
  0x52   : > { %p2587_p10 = pnand %p2585_p8, %p2747_p11  ;;  %p2594_p6 = por %p2593_p13, %p2592_p5 }
  0x54   : > { %p2588_p12 = pneg %p2587_p10 }
  0x56   : > { %p2595_p7 = pnand %p2594_p6, %p2588_p12 }
  0x58   : > { %2598 = shalt.err (!%p2595_p7)
}
  0x59   : > { %2170 = dma.hbm_to_vmem [thread:$0]  (!%p2733_p9), %s2917_s4, 12288, %s218_s19, [#allocation9], %s2651_s29, %s2651_s29, %s2652_s30  }
  0x5a   : > { %p2926_p0 = scmp.ne.s32.totalorder %s2923_s0, 0 }
  0x5b   : > { %p2927_p11 = scmp.eq.s32.totalorder (!%p2926_p0), %s2715_s14, 0 }
  0x5c   : > { %239 = sbr.rel (%p2926_p0) target bundleno = 589 (0x24d), region = 44 }
  0x63   : > { %2632 = dma.done.wait (%p2927_p11), [#allocation6], 512   ;;  %p2928_p1 = pmov %p2927_p11 }
  0x65   : > { %2634 = vsyncadd (%p2928_p1), [#allocation6], 4294966784  ;;  %p2929_p6 = pmov %p2928_p1 }
  0x66   : > { %p2930_p7 = pmov %p2928_p1 }
  0x67   : > { %2636 = dma.done.wait (%p2929_p6), [#allocation9], 24576  }
  0x68   : > { %2638 = vsyncadd (%p2930_p7), [#allocation9], 4294942720  ;;  %p2931_p2 = scmp.ne.s32.totalorder %s2715_s14, 0 }
  0x69   : > { %v271_v0 = vld [vmem:[%s2915_s2] sm:$0x3] (!%p2931_p2)  ;;  %v272_v1 = vlaneseq (!%p2931_p2) }
  0x6a   : > { %270 = sbr.rel (%p2931_p2) target bundleno = 113 (0x71), region = 60 }
  0x6b   : > { %vm274_vm0 = vcmp.lt.s32.totalorder (!%p2931_p2), %v272_v1, 256 }
  0x6c   : > { %276 = vst.msk [vmem:[#allocation2] sm:$0x3] (!%p2931_p2), %vm274_vm0, %v271_v0 }
  0x71 PF: > { %v2197_v2 = vld [vmem:[#allocation8 + $0x4] ss:$24 sps:$4 sm:$0xff]   ;;  %v2201_v4 = vld [vmem:[#allocation8] ss:$24 sps:$4 sm:$0xff]   ;;  %v2203_v6 = vld [vmem:[#allocation8 + $0x34] ss:$24 sps:$4 sm:$0xff]   ;;  %v288_v39 = vlaneseq }
  0x72   : > { %v2199_v3 = vld [vmem:[#allocation8 + $0xc] ss:$24 sps:$4 sm:$0xff]   ;;  %909 = vmatprep.subr.bf16.mxu0 %v2197_v2  ;;  %v2202_v5 = vld [vmem:[#allocation8 + $0x8] ss:$24 sps:$4 sm:$0xff]   ;;  %v2205_v7 = vld [vmem:[#allocation8 + $0x3c] ss:$24 sps:$4 sm:$0xff]  }
  0x73   : > { %950 = vmatprep.subr.bf16.mxu1 %v2199_v3  ;;  %910 = vmatpush1.bf16.msra.mxu0 %v2201_v4  ;;  %v2207_v8 = vld [vmem:[#allocation8 + $0x30] ss:$24 sps:$4 sm:$0xff]   ;;  %v2209_v10 = vld [vmem:[#allocation8 + $0x64] ss:$24 sps:$4 sm:$0xff]   ;;  %v2213_v12 = vld [vmem:[#allocation8 + $0x60] ss:$24 sps:$4 sm:$0xff]  }
  0x74   : > { %951 = vmatpush1.bf16.msra.mxu1 %v2202_v5  ;;  %911 = vmatprep.subr.bf16.mxu0 %v2203_v6  ;;  %v2208_v9 = vld [vmem:[#allocation8 + $0x38] ss:$24 sps:$4 sm:$0xff]   ;;  %v2211_v11 = vld [vmem:[#allocation8 + $0x6c] ss:$24 sps:$4 sm:$0xff]   ;;  %v2214_v13 = vld [vmem:[#allocation8 + $0x68] ss:$24 sps:$4 sm:$0xff]  }
  0x75   : > { %952 = vmatprep.subr.bf16.mxu1 %v2205_v7  ;;  %v2215_v14 = vld [vmem:[#allocation8 + $0x94] ss:$24 sps:$4 sm:$0xff]   ;;  %v2219_v16 = vld [vmem:[#allocation8 + $0x90] ss:$24 sps:$4 sm:$0xff]   ;;  %v2221_v18 = vld [vmem:[#allocation8 + $0xc4] ss:$24 sps:$4 sm:$0xff]  }
  0x76   : > { %v2217_v15 = vld [vmem:[#allocation8 + $0x9c] ss:$24 sps:$4 sm:$0xff]   ;;  %v2220_v17 = vld [vmem:[#allocation8 + $0x98] ss:$24 sps:$4 sm:$0xff]   ;;  %v2223_v19 = vld [vmem:[#allocation8 + $0xcc] ss:$24 sps:$4 sm:$0xff]  }
  0x77   : > { %912 = vmatpush1.bf16.msra.mxu0 %v2207_v8  ;;  %v2225_v20 = vld [vmem:[#allocation8 + $0xc0] ss:$24 sps:$4 sm:$0xff]   ;;  %v2227_v22 = vld [vmem:[#allocation8 + $0xf4] ss:$24 sps:$4 sm:$0xff]   ;;  %v2231_v24 = vld [vmem:[#allocation8 + $0xf0] ss:$24 sps:$4 sm:$0xff]  }
  0x78   : > { %953 = vmatpush1.bf16.msra.mxu1 %v2208_v9  ;;  %913 = vmatprep.subr.bf16.mxu0 %v2209_v10  ;;  %v2226_v21 = vld [vmem:[#allocation8 + $0xc8] ss:$24 sps:$4 sm:$0xff]   ;;  %v2229_v23 = vld [vmem:[#allocation8 + $0xfc] ss:$24 sps:$4 sm:$0xff]   ;;  %v2232_v25 = vld [vmem:[#allocation8 + $0xf8] ss:$24 sps:$4 sm:$0xff]  }
  0x79   : > { %954 = vmatprep.subr.bf16.mxu1 %v2211_v11  ;;  %v2233_v26 = vld [vmem:[#allocation8 + $0x124] ss:$24 sps:$4 sm:$0xff]   ;;  %v2237_v28 = vld [vmem:[#allocation8 + $0x120] ss:$24 sps:$4 sm:$0xff]   ;;  %s2832_s0 = sld [smem:[#allocation4 + %s2715_s14]]  ;;  %v2837_v44 = vshrl.u32 %v288_v39, 7 }
  0x7a   : > { %v2235_v27 = vld [vmem:[#allocation8 + $0x12c] ss:$24 sps:$4 sm:$0xff]   ;;  %v2238_v29 = vld [vmem:[#allocation8 + $0x128] ss:$24 sps:$4 sm:$0xff]   ;;  %v2241_v31 = vld [vmem:[#allocation8 + $0x15c] ss:$24 sps:$4 sm:$0xff]  }
  0x7b   : > { %914 = vmatpush1.bf16.msra.mxu0 %v2213_v12  ;;  %v2239_v30 = vld [vmem:[#allocation8 + $0x154] ss:$24 sps:$4 sm:$0xff]   ;;  %v2243_v32 = vld [vmem:[#allocation8 + $0x150] ss:$24 sps:$4 sm:$0xff]   ;;  %v2245_v34 = vld [vmem:[#allocation8 + $0x184] ss:$24 sps:$4 sm:$0xff]  }
  0x7c   : > { %955 = vmatpush1.bf16.msra.mxu1 %v2214_v13  ;;  %915 = vmatprep.subr.bf16.mxu0 %v2215_v14  ;;  %v2244_v33 = vld [vmem:[#allocation8 + $0x158] ss:$24 sps:$4 sm:$0xff]   ;;  %v2247_v35 = vld [vmem:[#allocation8 + $0x18c] ss:$24 sps:$4 sm:$0xff]   ;;  %v2250_v37 = vld [vmem:[#allocation8 + $0x188] ss:$24 sps:$4 sm:$0xff]  }
  0x7d   : > { %956 = vmatprep.subr.bf16.mxu1 %v2217_v15  ;;  %v2249_v36 = vld [vmem:[#allocation8 + $0x180] ss:$24 sps:$4 sm:$0xff]   ;;  %v2251_v38 = vld [vmem:[#allocation8 + $0x1b4] ss:$24 sps:$4 sm:$0xff]   ;;  %v2255_v41 = vld [vmem:[#allocation8 + $0x1b0] ss:$24 sps:$4 sm:$0xff]  }
  0x7e   : > { %v2253_v40 = vld [vmem:[#allocation8 + $0x1bc] ss:$24 sps:$4 sm:$0xff]   ;;  %v2256_v42 = vld [vmem:[#allocation8 + $0x1b8] ss:$24 sps:$4 sm:$0xff]   ;;  %v2259_v45 = vld [vmem:[#allocation8 + $0x1ec] ss:$24 sps:$4 sm:$0xff]  }
  0x7f   : > { %916 = vmatpush1.bf16.msra.mxu0 %v2219_v16  ;;  %s278_s25 = sshra.s32 %s2832_s0, 3  ;;  %s281_s29 = sand.u32 7, %s2832_s0  ;;  %v2257_v43 = vld [vmem:[#allocation8 + $0x1e4] ss:$24 sps:$4 sm:$0xff]   ;;  %v2261_v46 = vld [vmem:[#allocation8 + $0x1e0] ss:$24 sps:$4 sm:$0xff]  }
  0x80   : > { %957 = vmatpush1.bf16.msra.mxu1 %v2220_v17  ;;  %917 = vmatprep.subr.bf16.mxu0 %v2221_v18  ;;  %s2131_s30 = sshll.u32 %s278_s25, 4  ;;  %v2262_v47 = vld [vmem:[#allocation8 + $0x1e8] ss:$24 sps:$4 sm:$0xff]   ;;  %v2263_v48 = vld [vmem:[#allocation8 + $0x214] ss:$24 sps:$4 sm:$0xff]   ;;  %v2840_v49 = vsub.s32 1, %v2837_v44 }
  0x81   : > { %958 = vmatprep.subr.bf16.mxu1 %v2223_v19  ;;  %s284_s22 = sadd.s32 %s2131_s30, %s281_s29  ;;  %v2265_v50 = vld [vmem:[#allocation8 + $0x21c] ss:$24 sps:$4 sm:$0xff]   ;;  %v2267_v51 = vld [vmem:[#allocation8 + $0x210] ss:$24 sps:$4 sm:$0xff]   ;;  %v2271_v56 = vld [vmem:[#allocation8 + $0x24c] ss:$24 sps:$4 sm:$0xff]  }
  0x82   : > { %s285_s13 = scalar_lea.vmem [#allocation5], %s284_s22  ;;  %v2268_v53 = vld [vmem:[#allocation8 + $0x218] ss:$24 sps:$4 sm:$0xff]   ;;  %v2269_v55 = vld [vmem:[#allocation8 + $0x244] ss:$24 sps:$4 sm:$0xff]   ;;  %v2844_v3 = vsub.s32 0, %v2837_v44 }
  0x83   : > { %918 = vmatpush1.bf16.msra.mxu0 %v2225_v20  ;;  %v286_v52 = vld [vmem:[%s285_s13] ss:$8 sm:$0x3]  ;;  %v2273_v58 = vld [vmem:[#allocation8 + $0x240] ss:$24 sps:$4 sm:$0xff]   ;;  %s1836_s28 = sshra.s32 %s2715_s14, 3 }
  0x84   : > { %959 = vmatpush1.bf16.msra.mxu1 %v2226_v21  ;;  %919 = vmatprep.subr.bf16.mxu0 %v2227_v22  ;;  %v295_v54 = vrot.slane %v286_v52, %v2840_v49  ;;  %v2274_v59 = vld [vmem:[#allocation8 + $0x248] ss:$24 sps:$4 sm:$0xff]   ;;  %v2275_v60 = vld [vmem:[#allocation8 + $0x274] ss:$24 sps:$4 sm:$0xff]   ;;  %v2280_v63 = vld [vmem:[#allocation8 + $0x278] ss:$24 sps:$4 sm:$0xff]   ;;  %v291_v8 = vrot.slane %v286_v52, %v2844_v3 }
  0x85   : > { %960 = vmatprep.subr.bf16.mxu1 %v2229_v23  ;;  %v2277_v61 = vld [vmem:[#allocation8 + $0x27c] ss:$24 sps:$4 sm:$0xff]   ;;  %v2279_v62 = vld [vmem:[#allocation8 + $0x270] ss:$24 sps:$4 sm:$0xff]   ;;  %v2283_v1 = vld [vmem:[#allocation8 + $0x2ac] ss:$24 sps:$4 sm:$0xff]  }
  0x86   : > { %v299_v57 = vpack.c.bf16 %v295_v54, %v295_v54  ;;  %v2281_v0 = vld [vmem:[#allocation8 + $0x2a4] ss:$24 sps:$4 sm:$0xff]   ;;  %v2285_v2 = vld [vmem:[#allocation8 + $0x2a0] ss:$24 sps:$4 sm:$0xff]   ;;  %v2287_v5 = vld [vmem:[#allocation8 + $0x2d4] ss:$24 sps:$4 sm:$0xff]   ;;  %v2847_v13 = vpack.c.bf16 %v291_v8, %v291_v8 }
  0x87   : > { %920 = vmatpush1.bf16.msra.mxu0 %v2231_v24  ;;  %v2286_v4 = vld [vmem:[#allocation8 + $0x2a8] ss:$24 sps:$4 sm:$0xff]   ;;  %v2289_v6 = vld [vmem:[#allocation8 + $0x2dc] ss:$24 sps:$4 sm:$0xff]   ;;  %v2292_v9 = vld [vmem:[#allocation8 + $0x2d8] ss:$24 sps:$4 sm:$0xff]  }
  0x88   : > { %961 = vmatpush1.bf16.msra.mxu1 %v2232_v25  ;;  %921 = vmatprep.subr.bf16.mxu0 %v2233_v26  ;;  %v2291_v7 = vld [vmem:[#allocation8 + $0x2d0] ss:$24 sps:$4 sm:$0xff]   ;;  %v2295_v10 = vld [vmem:[#allocation8 + $0x14] ss:$24 sps:$4 sm:$0xff]   ;;  %v2301_v15 = vld [vmem:[#allocation8 + $0x44] ss:$24 sps:$4 sm:$0xff]  }
  0x89   : > { %962 = vmatprep.subr.bf16.mxu1 %v2235_v27  ;;  %941 = vmatprep.mubr.bf16.mxu0 %v299_v57  ;;  %v2298_v11 = vld [vmem:[#allocation10 + $0xc] ss:$24 sps:$4 sm:$0xff]   ;;  %v2293_v12 = vld [vmem:[#allocation8 + $0x10] ss:$24 sps:$4 sm:$0xff]   ;;  %v2304_v16 = vld [vmem:[#allocation10 + $0x3c] ss:$24 sps:$4 sm:$0xff]  }
  0x8a   : > { %982 = vmatprep.mubr.bf16.mxu1 %v299_v57  ;;  %v2296_v14 = vld [vmem:[#allocation10 + $0x8] ss:$24 sps:$4 sm:$0xff]   ;;  %v2302_v18 = vld [vmem:[#allocation10 + $0x38] ss:$24 sps:$4 sm:$0xff]   ;;  %v2307_v19 = vld [vmem:[#allocation8 + $0x74] ss:$24 sps:$4 sm:$0xff]  }
  0x8b   : > { %922 = vmatpush1.bf16.msra.mxu0 %v2237_v28  ;;  %v2299_v17 = vld [vmem:[#allocation8 + $0x40] ss:$24 sps:$4 sm:$0xff]   ;;  %v2310_v20 = vld [vmem:[#allocation10 + $0x6c] ss:$24 sps:$4 sm:$0xff]   ;;  %v2305_v21 = vld [vmem:[#allocation8 + $0x70] ss:$24 sps:$4 sm:$0xff]  }
  0x8c   : > { %963 = vmatpush1.bf16.msra.mxu1 %v2238_v29  ;;  %923 = vmatprep.subr.bf16.mxu0 %v2239_v30  ;;  %v2308_v22 = vld [vmem:[#allocation10 + $0x68] ss:$24 sps:$4 sm:$0xff]   ;;  %v2313_v23 = vld [vmem:[#allocation8 + $0xa4] ss:$24 sps:$4 sm:$0xff]   ;;  %v2314_v26 = vld [vmem:[#allocation10 + $0x98] ss:$24 sps:$4 sm:$0xff]  }
  0x8d   : > { %964 = vmatprep.subr.bf16.mxu1 %v2241_v31  ;;  %v2316_v24 = vld [vmem:[#allocation10 + $0x9c] ss:$24 sps:$4 sm:$0xff]   ;;  %v2311_v25 = vld [vmem:[#allocation8 + $0xa0] ss:$24 sps:$4 sm:$0xff]   ;;  %v2322_v28 = vld [vmem:[#allocation10 + $0xcc] ss:$24 sps:$4 sm:$0xff]  }
  0x8e   : > { %v2319_v27 = vld [vmem:[#allocation8 + $0xd4] ss:$24 sps:$4 sm:$0xff]   ;;  %v2317_v29 = vld [vmem:[#allocation8 + $0xd0] ss:$24 sps:$4 sm:$0xff]   ;;  %v2325_v31 = vld [vmem:[#allocation8 + $0x104] ss:$24 sps:$4 sm:$0xff]  }
  0x8f   : > { %924 = vmatpush1.bf16.msra.mxu0 %v2243_v32  ;;  %v2320_v30 = vld [vmem:[#allocation10 + $0xc8] ss:$24 sps:$4 sm:$0xff]   ;;  %v2328_v32 = vld [vmem:[#allocation10 + $0xfc] ss:$24 sps:$4 sm:$0xff]   ;;  %s1839_s8 = sand.u32 7, %s2715_s14  ;;  %s2132_s9 = sshll.u32 %s1836_s28, 4 }
  0x90   : > { %965 = vmatpush1.bf16.msra.mxu1 %v2244_v33  ;;  %925 = vmatprep.subr.bf16.mxu0 %v2245_v34  ;;  %v2323_v33 = vld [vmem:[#allocation8 + $0x100] ss:$24 sps:$4 sm:$0xff]   ;;  %v2352_v54 = vld [vmem:[#allocation10 + $0x1bc] ss:$24 sps:$4 sm:$0xff]   ;;  %s1842_s10 = sadd.s32 %s2132_s9, %s1839_s8  ;;  %s2656_s12 = smov [#allocation11]   ;;  %vm1833_vm1 = vcmp.lt.s32.totalorder %v288_v39, 256 }
  0x91   : > { %966 = vmatprep.subr.bf16.mxu1 %v2247_v35  ;;  %v2326_v34 = vld [vmem:[#allocation10 + $0xf8] ss:$24 sps:$4 sm:$0xff]   ;;  %v2331_v35 = vld [vmem:[#allocation8 + $0x134] ss:$24 sps:$4 sm:$0xff]   ;;  %v2344_v52 = vld [vmem:[#allocation10 + $0x188] ss:$24 sps:$4 sm:$0xff]  }
  0x92   : > { %v2371_v8 = vld [vmem:[#allocation8 + $0x280] ss:$24 sps:$4 sm:$0xff]   ;;  %s1853_s15 = sshll.u32 %s2656_s12, 4  ;;  %p2177_p9 = scmp.eq.s32.totalorder %s2715_s14, 7  ;;  %s1854_s15 = int_to_ptr.vmem [resolvable:$true] %s1853_s15 }
  0x93   : > { %926 = vmatpush1.bf16.msra.mxu0 %v2249_v36  ;;  %v2334_v36 = vld [vmem:[#allocation10 + $0x12c] ss:$24 sps:$4 sm:$0xff]   ;;  %s1843_s18 = scalar_lea.vmem [#allocation11], %s1842_s10  ;;  %s2599_s20 = scalar_lea.vmem %s1854_s15, 256 }
  0x94   : > { %967 = vmatpush1.bf16.msra.mxu1 %v2250_v37  ;;  %927 = vmatprep.subr.bf16.mxu0 %v2251_v38  ;;  %v2851_v37 = vld [vmem:[#allocation2] sm:$0x3]  ;;  %p2600_p3 = scmp.ne.s32.totalorder %s1854_s15, %s2599_s20  ;;  %p2606_p10 = scmp.lt.s32.totalorder %s1854_s15, %s1854_s15 }
  0x95   : > { %968 = vmatprep.subr.bf16.mxu1 %v2253_v40  ;;  %v1040_v38 = vrot.slane %v2851_v37, %v2840_v49  ;;  %v2329_v40 = vld [vmem:[#allocation8 + $0x130] ss:$24 sps:$4 sm:$0xff]   ;;  %p2607_p12 = scmp.lt.s32.totalorder %s2599_s20, %s2599_s20 }
  0x96   : > { %p2601_p4 = pnand %p2600_p3, %p2177_p9 }
  0x97   : > { %928 = vmatpush1.bf16.msra.mxu0 %v2255_v41  ;;  %v2332_v41 = vld [vmem:[#allocation10 + $0x128] ss:$24 sps:$4 sm:$0xff]   ;;  %p2608_p5 = por %p2607_p12, %p2606_p10 }
  0x98   : > { %969 = vmatpush1.bf16.msra.mxu1 %v2256_v42  ;;  %929 = vmatprep.subr.bf16.mxu0 %v2257_v43  ;;  %v2855_v42 = vpack.c.bf16 %v1040_v38, %v1040_v38  ;;  %v2337_v43 = vld [vmem:[#allocation8 + $0x164] ss:$24 sps:$4 sm:$0xff]   ;;  %v2433_v38 = vld [vmem:[#allocation10 + $0xd4] ss:$24 sps:$4 sm:$0xff]   ;;  %p2602_p8 = pneg %p2601_p4 }
  0x99   : > { %970 = vmatprep.subr.bf16.mxu1 %v2259_v45  ;;  %v2340_v45 = vld [vmem:[#allocation10 + $0x15c] ss:$24 sps:$4 sm:$0xff]  }
  0x9a   : > { %p2609_p13 = pnand %p2608_p5, %p2602_p8 }
  0x9b   : > { %930 = vmatpush1.bf16.msra.mxu0 %v2261_v46  ;;  %v2335_v46 = vld [vmem:[#allocation8 + $0x160] ss:$24 sps:$4 sm:$0xff]  }
  0x9c   : > { %971 = vmatpush1.bf16.msra.mxu1 %v2262_v47  ;;  %931 = vmatprep.subr.bf16.mxu0 %v2263_v48  ;;  %v2338_v47 = vld [vmem:[#allocation10 + $0x158] ss:$24 sps:$4 sm:$0xff]   ;;  %v2343_v48 = vld [vmem:[#allocation8 + $0x194] ss:$24 sps:$4 sm:$0xff]  }
  0x9d   : > { %972 = vmatprep.subr.bf16.mxu1 %v2265_v50  ;;  %v2346_v50 = vld [vmem:[#allocation10 + $0x18c] ss:$24 sps:$4 sm:$0xff]  }
  0x9f   : > { %932 = vmatpush1.bf16.msra.mxu0 %v2267_v51  ;;  %v2341_v51 = vld [vmem:[#allocation8 + $0x190] ss:$24 sps:$4 sm:$0xff]  }
  0xa0   : > { %973 = vmatpush1.bf16.msra.mxu1 %v2268_v53  ;;  %933 = vmatprep.subr.bf16.mxu0 %v2269_v55  ;;  %v2349_v53 = vld [vmem:[#allocation8 + $0x1c4] ss:$24 sps:$4 sm:$0xff]   ;;  %v2347_v55 = vld [vmem:[#allocation8 + $0x1c0] ss:$24 sps:$4 sm:$0xff]  }
  0xa1   : > { %974 = vmatprep.subr.bf16.mxu1 %v2271_v56  ;;  %v2350_v56 = vld [vmem:[#allocation10 + $0x1b8] ss:$24 sps:$4 sm:$0xff]  }
  0xa3   : > { %934 = vmatpush1.bf16.msra.mxu0 %v2273_v58  ;;  %v2358_v58 = vld [vmem:[#allocation10 + $0x1ec] ss:$24 sps:$4 sm:$0xff]  }
  0xa4   : > { %975 = vmatpush1.bf16.msra.mxu1 %v2274_v59  ;;  %935 = vmatprep.subr.bf16.mxu0 %v2275_v60  ;;  %v2353_v59 = vld [vmem:[#allocation8 + $0x1f0] ss:$24 sps:$4 sm:$0xff]  }
  0xa5   : > { %976 = vmatprep.subr.bf16.mxu1 %v2277_v61  ;;  %v2356_v60 = vld [vmem:[#allocation10 + $0x1e8] ss:$24 sps:$4 sm:$0xff]   ;;  %v2361_v61 = vld [vmem:[#allocation8 + $0x224] ss:$24 sps:$4 sm:$0xff]  }
  0xa7   : > { %936 = vmatpush1.bf16.msra.mxu0 %v2279_v62  ;;  %v2364_v62 = vld [vmem:[#allocation10 + $0x21c] ss:$24 sps:$4 sm:$0xff]  }
  0xa8   : > { %977 = vmatpush1.bf16.msra.mxu1 %v2280_v63  ;;  %937 = vmatprep.subr.bf16.mxu0 %v2281_v0  ;;  %v2359_v63 = vld [vmem:[#allocation8 + $0x220] ss:$24 sps:$4 sm:$0xff]  }
  0xa9   : > { %978 = vmatprep.subr.bf16.mxu1 %v2283_v1  ;;  %v2362_v0 = vld [vmem:[#allocation10 + $0x218] ss:$24 sps:$4 sm:$0xff]   ;;  %v2367_v1 = vld [vmem:[#allocation8 + $0x254] ss:$24 sps:$4 sm:$0xff]  }
  0xab   : > { %938 = vmatpush1.bf16.msra.mxu0 %v2285_v2  ;;  %v2370_v2 = vld [vmem:[#allocation10 + $0x24c] ss:$24 sps:$4 sm:$0xff]  }
  0xac   : > { %979 = vmatpush1.bf16.msra.mxu1 %v2286_v4  ;;  %939 = vmatprep.subr.bf16.mxu0 %v2287_v5  ;;  %v2365_v4 = vld [vmem:[#allocation8 + $0x250] ss:$24 sps:$4 sm:$0xff]  }
  0xad   : > { %980 = vmatprep.subr.bf16.mxu1 %v2289_v6  ;;  %v2368_v5 = vld [vmem:[#allocation10 + $0x248] ss:$24 sps:$4 sm:$0xff]   ;;  %v2373_v6 = vld [vmem:[#allocation8 + $0x284] ss:$24 sps:$4 sm:$0xff]  }
  0xaf   : > { %940 = vmatpush1.bf16.msra.mxu0 %v2291_v7  ;;  %v2376_v7 = vld [vmem:[#allocation10 + $0x27c] ss:$24 sps:$4 sm:$0xff]  }
  0xb0   : > { %981 = vmatpush1.bf16.msra.mxu1 %v2292_v9  ;;  %991 = vmatprep.subr.bf16.mxu0 %v2295_v10  ;;  %v2374_v9 = vld [vmem:[#allocation10 + $0x278] ss:$24 sps:$4 sm:$0xff]   ;;  %v2379_v10 = vld [vmem:[#allocation8 + $0x2b4] ss:$24 sps:$4 sm:$0xff]  }
  0xb1   : > { %1662 = vmatprep.subr.bf16.mxu1 %v2298_v11  ;;  %v2382_v11 = vld [vmem:[#allocation10 + $0x2ac] ss:$24 sps:$4 sm:$0xff]  }
  0xb2   : > { %942 = vmatmul.mubr.bf16.vlgmr.msra.gmra.mrb[0].mxu0 %v2847_v13 }
  0xb3   : > { %983 = vmatmul.mubr.bf16.vlgmr.msra.gmra.mrb[0].mxu1 %v2847_v13  ;;  %992 = vmatpush1.bf16.msra.mxu0 %v2293_v12  ;;  %v2377_v12 = vld [vmem:[#allocation8 + $0x2b0] ss:$24 sps:$4 sm:$0xff]  }
  0xb4   : > { %1663 = vmatpush1.bf16.msra.mxu1 %v2296_v14  ;;  %993 = vmatprep.subr.bf16.mxu0 %v2301_v15  ;;  %v2380_v14 = vld [vmem:[#allocation10 + $0x2a8] ss:$24 sps:$4 sm:$0xff]   ;;  %v2385_v15 = vld [vmem:[#allocation8 + $0x2e4] ss:$24 sps:$4 sm:$0xff]  }
  0xb5   : > { %1664 = vmatprep.subr.bf16.mxu1 %v2304_v16  ;;  %1023 = vmatprep.mubr.bf16.mxu0 %v299_v57  ;;  %v2355_v57 = vld [vmem:[#allocation8 + $0x1f4] ss:$24 sps:$4 sm:$0xff]  }
  0xb6   : > { %1694 = vmatprep.mubr.bf16.mxu1 %v2855_v42  ;;  %v2388_v16 = vld [vmem:[#allocation10 + $0x2dc] ss:$24 sps:$4 sm:$0xff]  }
  0xb7   : > { %994 = vmatpush1.bf16.msra.mxu0 %v2299_v17  ;;  %v1036_v17 = vrot.slane %v2851_v37, %v2844_v3 }
  0xb8   : > { %1665 = vmatpush1.bf16.msra.mxu1 %v2302_v18  ;;  %995 = vmatprep.subr.bf16.mxu0 %v2307_v19  ;;  %v2383_v18 = vld [vmem:[#allocation8 + $0x2e0] ss:$24 sps:$4 sm:$0xff]  }
  0xb9   : > { %1666 = vmatprep.subr.bf16.mxu1 %v2310_v20  ;;  %v2386_v19 = vld [vmem:[#allocation10 + $0x2d8] ss:$24 sps:$4 sm:$0xff]   ;;  %v2391_v20 = vld [vmem:[#allocation10 + $0x4] ss:$24 sps:$4 sm:$0xff]  }
  0xbb   : > { %996 = vmatpush1.bf16.msra.mxu0 %v2305_v21  ;;  %v2409_v21 = vld [vmem:[#allocation10 + $0x14] ss:$24 sps:$4 sm:$0xff]  }
  0xbc   : > { %1667 = vmatpush1.bf16.msra.mxu1 %v2308_v22  ;;  %997 = vmatprep.subr.bf16.mxu0 %v2313_v23  ;;  %v2860_v22 = vpack.c.bf16 %v1036_v17, %v1036_v17  ;;  %v2389_v23 = vld [vmem:[#allocation10] ss:$24 sps:$4 sm:$0xff]  }
  0xbd   : > { %1668 = vmatprep.subr.bf16.mxu1 %v2316_v24  ;;  %v2407_v24 = vld [vmem:[#allocation10 + $0x10] ss:$24 sps:$4 sm:$0xff]   ;;  %v2476_v17 = vld [vmem:[#allocation10 + $0x280] ss:$24 sps:$4 sm:$0xff]  }
  0xbf   : > { %998 = vmatpush1.bf16.msra.mxu0 %v2311_v25  ;;  %v2394_v25 = vld [vmem:[#allocation10 + $0x34] ss:$24 sps:$4 sm:$0xff]  }
  0xc0   : > { %1669 = vmatpush1.bf16.msra.mxu1 %v2314_v26  ;;  %999 = vmatprep.subr.bf16.mxu0 %v2319_v27  ;;  %v2415_v26 = vld [vmem:[#allocation10 + $0x44] ss:$24 sps:$4 sm:$0xff]   ;;  %v2392_v27 = vld [vmem:[#allocation10 + $0x30] ss:$24 sps:$4 sm:$0xff]  }
  0xc1   : > { %1670 = vmatprep.subr.bf16.mxu1 %v2322_v28  ;;  %v2413_v28 = vld [vmem:[#allocation10 + $0x40] ss:$24 sps:$4 sm:$0xff]  }
  0xc3   : > { %1000 = vmatpush1.bf16.msra.mxu0 %v2317_v29  ;;  %v2397_v29 = vld [vmem:[#allocation10 + $0x64] ss:$24 sps:$4 sm:$0xff]  }
  0xc4   : > { %1671 = vmatpush1.bf16.msra.mxu1 %v2320_v30  ;;  %1001 = vmatprep.subr.bf16.mxu0 %v2325_v31  ;;  %v2421_v30 = vld [vmem:[#allocation10 + $0x74] ss:$24 sps:$4 sm:$0xff]   ;;  %v2395_v31 = vld [vmem:[#allocation10 + $0x60] ss:$24 sps:$4 sm:$0xff]  }
  0xc5   : > { %1672 = vmatprep.subr.bf16.mxu1 %v2328_v32  ;;  %v2419_v32 = vld [vmem:[#allocation10 + $0x70] ss:$24 sps:$4 sm:$0xff]  }
  0xc7   : > { %1002 = vmatpush1.bf16.msra.mxu0 %v2323_v33  ;;  %v2427_v33 = vld [vmem:[#allocation10 + $0xa4] ss:$24 sps:$4 sm:$0xff]  }
  0xc8   : > { %1673 = vmatpush1.bf16.msra.mxu1 %v2326_v34  ;;  %1003 = vmatprep.subr.bf16.mxu0 %v2331_v35  ;;  %v2398_v34 = vld [vmem:[#allocation10 + $0x90] ss:$24 sps:$4 sm:$0xff]   ;;  %v2425_v35 = vld [vmem:[#allocation10 + $0xa0] ss:$24 sps:$4 sm:$0xff]  }
  0xc9   : > { %1674 = vmatprep.subr.bf16.mxu1 %v2334_v36  ;;  %v2403_v36 = vld [vmem:[#allocation10 + $0xc4] ss:$24 sps:$4 sm:$0xff]  }
  0xcb   : > { %1004 = vmatpush1.bf16.msra.mxu0 %v2329_v40  ;;  %v2401_v40 = vld [vmem:[#allocation10 + $0xc0] ss:$24 sps:$4 sm:$0xff]  }
  0xcc   : > { %1675 = vmatpush1.bf16.msra.mxu1 %v2332_v41  ;;  %1005 = vmatprep.subr.bf16.mxu0 %v2337_v43  ;;  %v2431_v41 = vld [vmem:[#allocation10 + $0xd0] ss:$24 sps:$4 sm:$0xff]   ;;  %v2439_v43 = vld [vmem:[#allocation10 + $0x104] ss:$24 sps:$4 sm:$0xff]  }
  0xcd   : > { %1676 = vmatprep.subr.bf16.mxu1 %v2340_v45  ;;  %v2404_v45 = vld [vmem:[#allocation10 + $0xf0] ss:$24 sps:$4 sm:$0xff]  }
  0xcf   : > { %1006 = vmatpush1.bf16.msra.mxu0 %v2335_v46  ;;  %v2437_v46 = vld [vmem:[#allocation10 + $0x100] ss:$24 sps:$4 sm:$0xff]  }
  0xd0   : > { %1677 = vmatpush1.bf16.msra.mxu1 %v2338_v47  ;;  %1007 = vmatprep.subr.bf16.mxu0 %v2343_v48  ;;  %v2412_v47 = vld [vmem:[#allocation10 + $0x124] ss:$24 sps:$4 sm:$0xff]   ;;  %v2445_v48 = vld [vmem:[#allocation10 + $0x134] ss:$24 sps:$4 sm:$0xff]  }
  0xd1   : > { %1678 = vmatprep.subr.bf16.mxu1 %v2346_v50  ;;  %v2410_v50 = vld [vmem:[#allocation10 + $0x120] ss:$24 sps:$4 sm:$0xff]  }
  0xd3   : > { %1008 = vmatpush1.bf16.msra.mxu0 %v2341_v51  ;;  %v2443_v51 = vld [vmem:[#allocation10 + $0x130] ss:$24 sps:$4 sm:$0xff]  }
  0xd4   : > { %1679 = vmatpush1.bf16.msra.mxu1 %v2344_v52  ;;  %1009 = vmatprep.subr.bf16.mxu0 %v2349_v53  ;;  %v2418_v52 = vld [vmem:[#allocation10 + $0x154] ss:$24 sps:$4 sm:$0xff]   ;;  %v2451_v53 = vld [vmem:[#allocation10 + $0x164] ss:$24 sps:$4 sm:$0xff]  }
  0xd5   : > { %1680 = vmatprep.subr.bf16.mxu1 %v2352_v54  ;;  %v2416_v54 = vld [vmem:[#allocation10 + $0x150] ss:$24 sps:$4 sm:$0xff]  }
  0xd7   : > { %1010 = vmatpush1.bf16.msra.mxu0 %v2347_v55  ;;  %v2449_v55 = vld [vmem:[#allocation10 + $0x160] ss:$24 sps:$4 sm:$0xff]  }
  0xd8   : > { %1681 = vmatpush1.bf16.msra.mxu1 %v2350_v56  ;;  %1011 = vmatprep.subr.bf16.mxu0 %v2355_v57  ;;  %v2424_v56 = vld [vmem:[#allocation10 + $0x184] ss:$24 sps:$4 sm:$0xff]   ;;  %v2457_v57 = vld [vmem:[#allocation10 + $0x194] ss:$24 sps:$4 sm:$0xff]  }
  0xd9   : > { %1682 = vmatprep.subr.bf16.mxu1 %v2358_v58  ;;  %v2422_v58 = vld [vmem:[#allocation10 + $0x180] ss:$24 sps:$4 sm:$0xff]  }
  0xdb   : > { %1012 = vmatpush1.bf16.msra.mxu0 %v2353_v59  ;;  %v2455_v59 = vld [vmem:[#allocation10 + $0x190] ss:$24 sps:$4 sm:$0xff]  }
  0xdc   : > { %1683 = vmatpush1.bf16.msra.mxu1 %v2356_v60  ;;  %1013 = vmatprep.subr.bf16.mxu0 %v2361_v61  ;;  %v2430_v60 = vld [vmem:[#allocation10 + $0x1b4] ss:$24 sps:$4 sm:$0xff]   ;;  %v2463_v61 = vld [vmem:[#allocation10 + $0x1c4] ss:$24 sps:$4 sm:$0xff]  }
  0xdd   : > { %1684 = vmatprep.subr.bf16.mxu1 %v2364_v62  ;;  %v2428_v62 = vld [vmem:[#allocation10 + $0x1b0] ss:$24 sps:$4 sm:$0xff]  }
  0xdf   : > { %1014 = vmatpush1.bf16.msra.mxu0 %v2359_v63  ;;  %v2461_v63 = vld [vmem:[#allocation10 + $0x1c0] ss:$24 sps:$4 sm:$0xff]  }
  0xe0   : > { %1685 = vmatpush1.bf16.msra.mxu1 %v2362_v0  ;;  %1015 = vmatprep.subr.bf16.mxu0 %v2367_v1  ;;  %v2436_v0 = vld [vmem:[#allocation10 + $0x1e4] ss:$24 sps:$4 sm:$0xff]   ;;  %v2469_v1 = vld [vmem:[#allocation10 + $0x1f4] ss:$24 sps:$4 sm:$0xff]  }
  0xe1   : > { %1686 = vmatprep.subr.bf16.mxu1 %v2370_v2  ;;  %v2434_v2 = vld [vmem:[#allocation10 + $0x1e0] ss:$24 sps:$4 sm:$0xff]  }
  0xe3   : > { %1016 = vmatpush1.bf16.msra.mxu0 %v2365_v4  ;;  %v2467_v4 = vld [vmem:[#allocation10 + $0x1f0] ss:$24 sps:$4 sm:$0xff]  }
  0xe4   : > { %1687 = vmatpush1.bf16.msra.mxu1 %v2368_v5  ;;  %1017 = vmatprep.subr.bf16.mxu0 %v2373_v6  ;;  %v2442_v5 = vld [vmem:[#allocation10 + $0x214] ss:$24 sps:$4 sm:$0xff]   ;;  %v2472_v6 = vld [vmem:[#allocation10 + $0x224] ss:$24 sps:$4 sm:$0xff]  }
  0xe5   : > { %1688 = vmatprep.subr.bf16.mxu1 %v2376_v7  ;;  %v2440_v7 = vld [vmem:[#allocation10 + $0x210] ss:$24 sps:$4 sm:$0xff]  }
  0xe7   : > { %1018 = vmatpush1.bf16.msra.mxu0 %v2371_v8  ;;  %v2470_v8 = vld [vmem:[#allocation10 + $0x220] ss:$24 sps:$4 sm:$0xff]  }
  0xe8   : > { %1689 = vmatpush1.bf16.msra.mxu1 %v2374_v9  ;;  %1019 = vmatprep.subr.bf16.mxu0 %v2379_v10  ;;  %v2448_v9 = vld [vmem:[#allocation10 + $0x244] ss:$24 sps:$4 sm:$0xff]   ;;  %v2475_v10 = vld [vmem:[#allocation10 + $0x254] ss:$24 sps:$4 sm:$0xff]  }
  0xe9   : > { %1690 = vmatprep.subr.bf16.mxu1 %v2382_v11  ;;  %v2446_v11 = vld [vmem:[#allocation10 + $0x240] ss:$24 sps:$4 sm:$0xff]  }
  0xeb   : > { %1020 = vmatpush1.bf16.msra.mxu0 %v2377_v12  ;;  %v2473_v12 = vld [vmem:[#allocation10 + $0x250] ss:$24 sps:$4 sm:$0xff]  }
  0xec   : > { %1691 = vmatpush1.bf16.msra.mxu1 %v2380_v14  ;;  %1021 = vmatprep.subr.bf16.mxu0 %v2385_v15  ;;  %v2454_v14 = vld [vmem:[#allocation10 + $0x274] ss:$24 sps:$4 sm:$0xff]   ;;  %v2478_v15 = vld [vmem:[#allocation10 + $0x284] ss:$24 sps:$4 sm:$0xff]  }
  0xed   : > { %1692 = vmatprep.subr.bf16.mxu1 %v2388_v16  ;;  %v2452_v16 = vld [vmem:[#allocation10 + $0x270] ss:$24 sps:$4 sm:$0xff]  }
  0xef   : > { %1022 = vmatpush1.bf16.msra.mxu0 %v2383_v18  ;;  %v2460_v18 = vld [vmem:[#allocation10 + $0x2a4] ss:$24 sps:$4 sm:$0xff]  }
  0xf0   : > { %1693 = vmatpush1.bf16.msra.mxu1 %v2386_v19  ;;  %1621 = vmatprep.subr.bf16.mxu0 %v2391_v20  ;;  %v2481_v19 = vld [vmem:[#allocation10 + $0x2b4] ss:$24 sps:$4 sm:$0xff]   ;;  %v2458_v20 = vld [vmem:[#allocation10 + $0x2a0] ss:$24 sps:$4 sm:$0xff]  }
  0xf1   : > { %1703 = vmatprep.subr.bf16.mxu1 %v2409_v21  ;;  %v2479_v21 = vld [vmem:[#allocation10 + $0x2b0] ss:$24 sps:$4 sm:$0xff]  }
  0xf2   : > { %1024 = vmatmul.mubr.bf16.vlgmr.msra.gmra.mrb[4].mxu0 %v2847_v13  ;;  %v2400_v13 = vld [vmem:[#allocation10 + $0x94] ss:$24 sps:$4 sm:$0xff]  }
  0xf3   : > { %1695 = vmatmul.mubr.bf16.vlgmr.msra.gmra.mrb[0].mxu1 %v2860_v22  ;;  %1622 = vmatpush1.bf16.msra.mxu0 %v2389_v23  ;;  %v2466_v23 = vld [vmem:[#allocation10 + $0x2d4] ss:$24 sps:$4 sm:$0xff]  }
  0xf4   : > { %1704 = vmatpush1.bf16.msra.mxu1 %v2407_v24  ;;  %1623 = vmatprep.subr.bf16.mxu0 %v2394_v25  ;;  %v2484_v24 = vld [vmem:[#allocation10 + $0x2e4] ss:$24 sps:$4 sm:$0xff]   ;;  %v2464_v25 = vld [vmem:[#allocation10 + $0x2d0] ss:$24 sps:$4 sm:$0xff]  }
  0xf5   : > { %1705 = vmatprep.subr.bf16.mxu1 %v2415_v26  ;;  %1653 = vmatprep.mubr.bf16.mxu0 %v2855_v42  ;;  %v2482_v26 = vld [vmem:[#allocation10 + $0x2e0] ss:$24 sps:$4 sm:$0xff]  }
  0xf6   : > { %1735 = vmatprep.mubr.bf16.mxu1 %v2855_v42  ;;  %v2406_v42 = vld [vmem:[#allocation10 + $0xf4] ss:$24 sps:$4 sm:$0xff]  }
  0xf7   : > { %1624 = vmatpush1.bf16.msra.mxu0 %v2392_v27  ;;  %v889_v27 = vsub.s32 2, %v2837_v44 }
  0xf8   : > { %1706 = vmatpush1.bf16.msra.mxu1 %v2413_v28  ;;  %1625 = vmatprep.subr.bf16.mxu0 %v2397_v29  ;;  %v397_v28 = vld [vmem:[%s2918_s5] sm:$0x3f]  ;;  %v893_v29 = vsub.s32 3, %v2837_v44 }
  0xf9   : > { %1707 = vmatprep.subr.bf16.mxu1 %v2421_v30  ;;  %v890_v30 = vrot.slane %v397_v28, %v889_v27 }
  0xfb   : > { %1626 = vmatpush1.bf16.msra.mxu0 %v2395_v31  ;;  %v894_v31 = vrot.slane %v397_v28, %v893_v29 }
  0xfc   : > { %1708 = vmatpush1.bf16.msra.mxu1 %v2419_v32  ;;  %1627 = vmatprep.subr.bf16.mxu0 %v2400_v13 }
  0xfd   : > { %1709 = vmatprep.subr.bf16.mxu1 %v2427_v33 }
  0xff   : > { %1628 = vmatpush1.bf16.msra.mxu0 %v2398_v34 }
 0x100   : > { %1710 = vmatpush1.bf16.msra.mxu1 %v2425_v35  ;;  %1629 = vmatprep.subr.bf16.mxu0 %v2403_v36 }
 0x101   : > { %1711 = vmatprep.subr.bf16.mxu1 %v2433_v38 }
 0x103   : > { %1630 = vmatpush1.bf16.msra.mxu0 %v2401_v40 }
 0x104   : > { %1712 = vmatpush1.bf16.msra.mxu1 %v2431_v41  ;;  %1631 = vmatprep.subr.bf16.mxu0 %v2406_v42 }
 0x105   : > { %1713 = vmatprep.subr.bf16.mxu1 %v2439_v43 }
 0x107   : > { %1632 = vmatpush1.bf16.msra.mxu0 %v2404_v45 }
 0x108   : > { %1714 = vmatpush1.bf16.msra.mxu1 %v2437_v46  ;;  %1633 = vmatprep.subr.bf16.mxu0 %v2412_v47 }
 0x109   : > { %1715 = vmatprep.subr.bf16.mxu1 %v2445_v48 }
 0x10b   : > { %1634 = vmatpush1.bf16.msra.mxu0 %v2410_v50 }
 0x10c   : > { %1716 = vmatpush1.bf16.msra.mxu1 %v2443_v51  ;;  %1635 = vmatprep.subr.bf16.mxu0 %v2418_v52 }
 0x10d   : > { %1717 = vmatprep.subr.bf16.mxu1 %v2451_v53  ;;  %v882_v53 = vrot.slane %v397_v28, %v2844_v3 }
 0x10f   : > { %1636 = vmatpush1.bf16.msra.mxu0 %v2416_v54  ;;  %v886_v54 = vrot.slane %v397_v28, %v2840_v49 }
 0x110   : > { %1718 = vmatpush1.bf16.msra.mxu1 %v2449_v55  ;;  %1637 = vmatprep.subr.bf16.mxu0 %v2424_v56 }
 0x111   : > { %1719 = vmatprep.subr.bf16.mxu1 %v2457_v57 }
 0x113   : > { %1638 = vmatpush1.bf16.msra.mxu0 %v2422_v58 }
 0x114   : > { %1720 = vmatpush1.bf16.msra.mxu1 %v2455_v59  ;;  %1639 = vmatprep.subr.bf16.mxu0 %v2430_v60 }
 0x115   : > { %1721 = vmatprep.subr.bf16.mxu1 %v2463_v61 }
 0x117   : > { %1640 = vmatpush1.bf16.msra.mxu0 %v2428_v62 }
 0x118   : > { %1722 = vmatpush1.bf16.msra.mxu1 %v2461_v63  ;;  %1641 = vmatprep.subr.bf16.mxu0 %v2436_v0 }
 0x119   : > { %1723 = vmatprep.subr.bf16.mxu1 %v2469_v1 }
 0x11b   : > { %1642 = vmatpush1.bf16.msra.mxu0 %v2434_v2 }
 0x11c   : > { %1724 = vmatpush1.bf16.msra.mxu1 %v2467_v4  ;;  %1643 = vmatprep.subr.bf16.mxu0 %v2442_v5 }
 0x11d   : > { %1725 = vmatprep.subr.bf16.mxu1 %v2472_v6 }
 0x11f   : > { %1644 = vmatpush1.bf16.msra.mxu0 %v2440_v7 }
 0x120   : > { %1726 = vmatpush1.bf16.msra.mxu1 %v2470_v8  ;;  %1645 = vmatprep.subr.bf16.mxu0 %v2448_v9  ;;  %v1772_v8 = vld [vmem:[%s2919_s6] sm:$0x3]  ;;  %v897_v9 = vsub.s32 4, %v2837_v44 }
 0x121   : > { %1727 = vmatprep.subr.bf16.mxu1 %v2475_v10  ;;  %v1777_v10 = vrot.slane %v1772_v8, %v2844_v3  ;;  %v2655_v3 = vmov 1966171168  }
 0x122   : > { %v1796_v27 = vunpack.c.l.s4 %v2655_v3 }
 0x123   : > { %1646 = vmatpush1.bf16.msra.mxu0 %v2446_v11  ;;  %v901_v11 = vsub.s32 5, %v2837_v44 }
 0x124   : > { %1728 = vmatpush1.bf16.msra.mxu1 %v2473_v12  ;;  %1647 = vmatprep.subr.bf16.mxu0 %v2454_v14  ;;  %v1781_v12 = vrot.slane %v1772_v8, %v2840_v49  ;;  %v898_v14 = vrot.slane %v397_v28, %v897_v9  ;;  %v1797_v29 = vunpack.c.0.s8 %v1796_v27 }
 0x125   : > { %1729 = vmatprep.subr.bf16.mxu1 %v2478_v15 }
 0x127   : > { %1648 = vmatpush1.bf16.msra.mxu0 %v2452_v16  ;;  %v902_v16 = vrot.slane %v397_v28, %v901_v11 }
 0x128   : > { %1730 = vmatpush1.bf16.msra.mxu1 %v2476_v17  ;;  %1649 = vmatprep.subr.bf16.mxu0 %v2460_v18 }
 0x129   : > { %1731 = vmatprep.subr.bf16.mxu1 %v2481_v19 }
 0x12b   : > { %1650 = vmatpush1.bf16.msra.mxu0 %v2458_v20 }
 0x12c   : > { %1732 = vmatpush1.bf16.msra.mxu1 %v2479_v21  ;;  %1651 = vmatprep.subr.bf16.mxu0 %v2466_v23 }
 0x12d   : > { %1733 = vmatprep.subr.bf16.mxu1 %v2484_v24 }
 0x12f   : > { %1652 = vmatpush1.bf16.msra.mxu0 %v2464_v25 }
 0x130   : > { %1734 = vmatpush1.bf16.msra.mxu1 %v2482_v26 }
 0x132   : > { %1654 = vmatmul.mubr.bf16.vlgmr.msra.gmra.mrb[0].mxu0 %v2860_v22 }
 0x133   : > { %1736 = vmatmul.mubr.bf16.vlgmr.msra.gmra.mrb[4].mxu1 %v2860_v22 }
 0x1c5   : > { %v1025_v32 = vpop.f32.mrb[4].mxu0 }
 0x1c6   : > { %v1696_v13 = vpop.f32.mrb[0].mxu1  ;;  %v1027_v34 = vpop.f32.mrb[5].mxu0  ;;  %v1026_v20 = vadd.f32 %v1025_v32, %v898_v14 }
 0x1c7   : > { %v2135_v33 = vadd.f32 %v1696_v13, %v890_v30  ;;  %v1698_v35 = vpop.f32.mrb[1].mxu1  ;;  %v1029_v38 = vpop.f32.mrb[6].mxu0  ;;  %v1028_v23 = vadd.f32 %v1027_v34, %v902_v16  ;;  %v1800_v30 = vsub.s32 %v1797_v29, %v2837_v44 }
 0x1c8   : > { %v2136_v36 = vadd.f32 %v1698_v35, %v894_v31  ;;  %v1700_v40 = vpop.f32.mrb[2].mxu1  ;;  %v1030_v22 = vpop.f32.mrb[7].mxu0 }
 0x1c9   : > { %v2123_v41 = vmul.f32 -1.442695, %v2135_v33  ;;  %v1701_v42 = vpop.f32.mrb[3].mxu1 }
 0x1ca   : > { %v2124_v43 = vmul.f32 -1.442695, %v2136_v36 }
 0x1cb   : > { %2485 = vpow2.f32 %v2123_v41 }
 0x1cc   : > { %2487 = vpow2.f32 %v2124_v43 }
 0x1d5   : > { %v2486_v45 = vpop.eup %2485 }
 0x1d6   : > { %v2488_v46 = vpop.eup %2487  ;;  %v1766_v47 = vadd.f32 1.0, %v2486_v45 }
 0x1d7   : > { %v1767_v48 = vadd.f32 1.0, %v2488_v46 }
 0x1d8   : > { %2489 = vrcp.f32 %v1766_v47 }
 0x1d9   : > { %2491 = vrcp.f32 %v1767_v48 }
 0x1e2   : > { %v2490_v50 = vpop.eup %2489 }
 0x1e3   : > { %v2492_v51 = vpop.eup %2491 }
 0x1e4   : > { %v1813_v52 = vcombine.low %v2490_v50, %v2492_v51 }
 0x1e6   : > { %v1820_v32 = vrot.slane %v1813_v52, %v1800_v30 }
 0x1e8   : > { %v1827_v35 = vrot.slane %v1820_v32, %v1800_v30 }
 0x205   : > { %v1655_v55 = vpop.f32.mrb[0].mxu0 }
 0x206   : > { %v1737_v56 = vpop.f32.mrb[4].mxu1  ;;  %v2133_v57 = vadd.f32 %v1655_v55, %v882_v53  ;;  %v1657_v58 = vpop.f32.mrb[1].mxu0 }
 0x207   : > { %v1739_v59 = vpop.f32.mrb[5].mxu1  ;;  %v2134_v60 = vadd.f32 %v1657_v58, %v886_v54  ;;  %v1659_v61 = vpop.f32.mrb[2].mxu0  ;;  %v1784_v15 = vadd.f32 %v1777_v10, %v1737_v56 }
 0x208   : > { %v1741_v62 = vpop.f32.mrb[6].mxu1  ;;  %v2121_v63 = vmul.f32 -1.442695, %v2133_v57  ;;  %v1660_v0 = vpop.f32.mrb[3].mxu0  ;;  %v1785_v17 = vadd.f32 %v1781_v12, %v1739_v59 }
 0x209   : > { %v1742_v1 = vpop.f32.mrb[7].mxu1  ;;  %v2122_v2 = vmul.f32 -1.442695, %v2134_v60 }
 0x20a   : > { %2493 = vpow2.f32 %v2121_v63 }
 0x20b   : > { %2495 = vpow2.f32 %v2122_v2 }
 0x214   : > { %v2494_v4 = vpop.eup %2493 }
 0x215   : > { %v2496_v5 = vpop.eup %2495  ;;  %v1752_v6 = vadd.f32 1.0, %v2494_v4 }
 0x216   : > { %v1753_v7 = vadd.f32 1.0, %v2496_v5 }
 0x217   : > { %2497 = vrcp.f32 %v1752_v6 }
 0x218   : > { %2499 = vrcp.f32 %v1753_v7 }
 0x221   : > { %v2498_v18 = vpop.eup %2497 }
 0x222   : > { %v2500_v19 = vpop.eup %2499  ;;  %v1786_v21 = vmul.f32 %v2498_v18, %v1784_v15 }
 0x223   : > { %v1787_v24 = vmul.f32 %v2500_v19, %v1785_v17 }
 0x224   : > { %v1788_v25 = vadd.f32 %v1786_v21, %v1026_v20 }
 0x225   : > { %v1789_v26 = vadd.f32 %v1787_v24, %v1028_v23 }
 0x226   : > { %2501 = vtanh.f32 %v1788_v25 }
 0x227   : > { %2503 = vtanh.f32 %v1789_v26 }
 0x230   : > { %v2502_v49 = vpop.eup %2501 }
 0x231   : > { %v2504_v28 = vpop.eup %2503 }
 0x232   : > { %v1794_v31 = vcombine.low %v2502_v49, %v2504_v28 }
 0x234   : > { %v1801_v13 = vrot.slane %v1794_v31, %v1800_v30 }
 0x236   : > { %v1808_v33 = vrot.slane %v1801_v13, %v1800_v30 }
 0x238   : > { %v1810_v34 = vsub.f32 %v2851_v37, %v1808_v33 }
 0x23a   : > { %v1829_v36 = vmul.f32 %v1827_v35, %v1810_v34 }
 0x23c   : > { %v1830_v44 = vadd.f32 %v1829_v36, %v1808_v33 }
 0x23e   : > { %1835 = vst.msk [vmem:[#allocation2] sm:$0x3] %vm1833_vm1, %v1830_v44  ;;  %1844 = vst.msk [vmem:[%s1843_s18] ss:$8 sm:$0x3] %vm1833_vm1, %v1830_v44 }
 0x23f   : > { %2612 = shalt.err (!%p2609_p13)
}
 0x240   : > { %s2613_s17 = scalar_lea.hbm %s2920_s7, 256 }
 0x241   : > { %p2614_p0 = scmp.ne.s32.totalorder %s2920_s7, %s2613_s17  ;;  %p2619_p6 = scmp.lt.u32.totalorder %s2613_s17, %s2920_s7 }
 0x243   : > { %p2615_p11 = pnand %p2614_p0, %p2177_p9 }
 0x245   : > { %p2616_p1 = pneg %p2615_p11 }
 0x247   : > { %p2621_p7 = pnand %p2619_p6, %p2616_p1 }
 0x249   : > { %2624 = shalt.err (!%p2621_p7)
}
 0x24a   : > { %2158 = dma.vmem_to_hbm [thread:$0]  (%p2177_p9), %s1854_s15, 256, %s2920_s7, [#allocation7]  }
 0x24b   : > { %2640 = dma.done.wait (%p2177_p9), [#allocation7], 256  }
 0x24c   : > { %2642 = vsyncadd (%p2177_p9), [#allocation7], 4294967040 }
 0x24d PF: > { %s24_s11 = sadd.s32 1, %s2645_s11  }
 0x24e   : > { %p21_p2 = scmp.ge.s32.totalorder %s24_s11, 10  }
 0x250   :  { %23 = sbr.rel (!%p21_p2) target bundleno = 15 (0xf), region = 87 }
 0x257   :  { %1866 = vsyncpa [#allocation6], 1 }
 0x258   :  { %1868 = vsyncpa [#allocation6 + $0x1], 1 }
 0x259   :  { %1869 = vsyncpa [#allocation9], 1 }
 0x25a   :  { %1870 = vsyncpa [#allocation7], 1 }
 0x25b   :  { %1872 = vsyncpa [#allocation7 + $0x1], 1 }

</bundles_post_ra>
